<compile_context>
chip_gen: v7x
topology: tpu7x:2x2x1
jax: 0.10.0
libtpu: 0.0.40
codegen_flags: <defaults>
</compile_context>

<pallas_src>
import jax
import jax.numpy as jnp
from jax.experimental import pallas as pl
from jax.experimental.pallas import tpu as pltpu

# Lane-width candidates (last dim of the flattened slab), largest first; all
# multiples of 128 so every vreg store is unmasked / lane-dense.
_LANE_CANDIDATES = (2048, 1024, 512, 256, 128)
# Target per-tile size: 4 MiB f32 -> in+out double-buffered = 16 MiB.
_TILE_BYTES_TARGET = 4 * 1024 * 1024
# Below this, skip Pallas entirely and let XLA fuse the elementwise op.
_MIN_PALLAS_BYTES = 1 * 1024 * 1024


def _round_up(n, m):
    return (n + m - 1) // m * m


def _residual_relu_kernel(x_ref, o_ref):
    # out = relu(x + residual), residual == x (Identity blocks & shortcut).
    v = x_ref[...]
    o_ref[...] = jnp.maximum(v + v, 0.0)


def residual_block_forward(x, in_channels, out_channels, activation="relu",
                           force_pallas=False):
    """Pallas implementation of ResidualBlock.forward for NCHW input x."""
    # blocks and shortcut are both nn.Identity -> math is relu(x + x)
    # regardless of whether in_channels == out_channels.
    assert activation == "relu", "only 'relu' wired up in this synthetic kernel"
    # TODO(synk): 'leaky_relu' / 'selu' / 'none' variants not wired up here.

    orig_shape = x.shape
    total = x.size
    itemsize = jnp.dtype(x.dtype).itemsize

    # Fast path: tiny activations (like the 8 KiB example) or element counts
    # that don't reshape to a lane-dense slab. A fused XLA elementwise is
    # strictly faster than paying the custom-call boundary + per-step cost.
    lanes = next((c for c in _LANE_CANDIDATES if total % c == 0), None)
    if lanes is None or (total * itemsize < _MIN_PALLAS_BYTES and not force_pallas):
        return jnp.maximum(x + x, 0.0).astype(x.dtype)

    # Free (bitcast) reshape to a lane-dense 2-D slab; no pad, no copy.
    rows = total // lanes
    x2d = x.reshape(rows, lanes)

    # Row-tile: multiple of 8 sublanes, capped at ~4 MiB per tile; at least
    # 2 tiles whenever rows > 8 so v7x megacore shards the grid across TCs.
    tr_max = max(8, (_TILE_BYTES_TARGET // (lanes * itemsize)) // 8 * 8)
    if rows <= 8:
        tr = rows                           # block == full array in row dim
    else:
        tr = min(tr_max, _round_up(pl.cdiv(rows, 2), 8))
    grid = (pl.cdiv(rows, tr),)             # ragged last tile is masked by Pallas

    out2d = pl.pallas_call(
        _residual_relu_kernel,
        out_shape=jax.ShapeDtypeStruct(x2d.shape, x2d.dtype),
        grid=grid,
        in_specs=[pl.BlockSpec((tr, lanes), lambda i: (i, 0))],
        out_specs=pl.BlockSpec((tr, lanes), lambda i: (i, 0)),
        compiler_params=pltpu.CompilerParams(
            dimension_semantics=("parallel",),
            vmem_limit_bytes=32 * 1024 * 1024,
        ),
        cost_estimate=pl.CostEstimate(
            flops=2 * total,
            transcendentals=0,
            bytes_accessed=2 * total * itemsize,
        ),
    )(x2d)

    return out2d.reshape(orig_shape)


if __name__ == "__main__":
    key = jax.random.PRNGKey(0)
    # Small NCHW input consistent with the module.
    x = jax.random.normal(key, (2, 4, 16, 16), dtype=jnp.float32)
    ref = jnp.maximum(x + x, 0.0)

    # Exercise the Pallas kernel explicitly (this small input would otherwise
    # take the fused-XLA fast path).
    out = residual_block_forward(x, in_channels=4, out_channels=4,
                                 activation="relu", force_pallas=True)
    out = jax.block_until_ready(out)
    assert out.shape == x.shape and out.dtype == x.dtype
    assert jnp.allclose(out, ref, atol=1e-6), "pallas path mismatch vs reference"

    # Default path (small input -> fused XLA elementwise) must also match.
    out_fast = jax.block_until_ready(
        residual_block_forward(x, in_channels=4, out_channels=4, activation="relu"))
    assert jnp.allclose(out_fast, ref, atol=1e-6), "fast path mismatch vs reference"

    print("KERNEL_OK")
</pallas_src>

<mosaic_0001>
module attributes {stable_mosaic.version = 11 : i64} {
  func.func @_residual_relu_kernel(%arg0: i32, %arg1: memref<1x2048xf32, #tpu.memory_space<vmem>>, %arg2: memref<1x2048xf32, #tpu.memory_space<vmem>>) attributes {dimension_semantics = [#tpu.dimension_semantics<parallel>], iteration_bounds = array<i64: 1>, scalar_prefetch = 0 : i64, scratch_operands = 0 : i64, tpu.core_type = #tpu.core_type<tc>, window_params = [{transform_indices = @transform_0, window_bounds = array<i64: 1, 2048>}, {transform_indices = @transform_1, window_bounds = array<i64: 1, 2048>}]} {
    %c0 = arith.constant 0 : index
    %c0_0 = arith.constant 0 : index
    %0 = vector.load %arg1[%c0, %c0_0] : memref<1x2048xf32, #tpu.memory_space<vmem>>, vector<1x2048xf32>
    %1 = arith.addf %0, %0 : vector<1x2048xf32>
    %cst = arith.constant 0.000000e+00 : f32
    %2 = vector.broadcast %cst : f32 to vector<1x2048xf32>
    %3 = arith.maximumf %1, %2 : vector<1x2048xf32>
    %c0_1 = arith.constant 0 : index
    %c0_2 = arith.constant 0 : index
    %4 = vector.load %arg2[%c0_1, %c0_2] : memref<1x2048xf32, #tpu.memory_space<vmem>>, vector<1x2048xf32>
    tpu.vector_store %arg2[%c0_1, %c0_2], %3 {strides = array<i32>} : memref<1x2048xf32, #tpu.memory_space<vmem>>, vector<1x2048xf32>,
    return
  }
  func.func @transform_0(%arg0: i32) -> (i32, i32) {
    %c0_i32 = arith.constant 0 : i32
    %c0_i32_0 = arith.constant 0 : i32
    return %arg0, %c0_i32 : i32, i32
  }
  func.func @transform_1(%arg0: i32) -> (i32, i32) {
    %c0_i32 = arith.constant 0 : i32
    %c0_i32_0 = arith.constant 0 : i32
    return %arg0, %c0_i32 : i32, i32
  }
}

</mosaic_0001>

<bundles_post_ra>
// kernel: tpu_custom_call.1
= control target key start
LH: loop header
LB: loop body
LE: loop exit
PB: predicated region body
PF: predicated region fallthrough
CT: control target
= control target key end

     0   :  { %6 = vsyncpa [#allocation3], 0  ;;  %s130_s0 = inlined_call_operand.hbm [shape: f32[1,2048], index: 0, kind: input, shape index: {}]   ;;  %s131_s1 = inlined_call_operand.hbm [shape: f32[1,2048], index: 1, kind: output, shape index: {}]  }
   0x1   :  { %7 = vsyncpa [#allocation4], 0  ;;  %s94_s6 = smov [#allocation2]   ;;  %s46_s10 = scalar_lea.hbm %s130_s0, 256 }
   0x2   :  { %s14_s7 = sshll.u32 %s94_s6, 4  ;;  %p47_p0 = scmp.ne.s32.totalorder %s130_s0, %s46_s10  ;;  %s15_s7 = int_to_ptr.vmem [resolvable:$true] %s14_s7 }
   0x3   :  { %p50_p1 = scmp.lt.u32.totalorder %s46_s10, %s130_s0 }
   0x5   :  { %p52_p2 = pnand %p50_p1, %p47_p0 }
   0x7   :  { %55 = shalt.err (!%p52_p2)
}
   0x8   :  { %s56_s15 = scalar_lea.vmem %s15_s7, 256  ;;  %p61_p4 = scmp.lt.s32.totalorder %s15_s7, %s15_s7 }
   0x9   :  { %p57_p3 = scmp.ne.s32.totalorder %s15_s7, %s56_s15  ;;  %p62_p5 = scmp.lt.s32.totalorder %s56_s15, %s56_s15 }
   0xb   :  { %p63_p6 = por %p62_p5, %p61_p4 }
   0xd   :  { %p64_p7 = pnand %p63_p6, %p57_p3 }
   0xf   :  { %67 = shalt.err (!%p64_p7)
}
  0x10   :  { %17 = dma.hbm_to_vmem [thread:$0]  %s130_s0, 256, %s15_s7, [#allocation3]  }
  0x11   :  { %90 = dma.done.wait [#allocation3], 256  }
  0x12   :  { %91 = vsyncadd [#allocation3], 4294967040  ;;  %v21_v0 = vld [vmem:[#allocation2] sm:$0xff]  ;;  %v22_v1 = vld [vmem:[#allocation2 + $0x8] sm:$0xff]  ;;  %s95_s18 = smov [#allocation5]  }
  0x13   :  { %s35_s19 = sshll.u32 %s95_s18, 4  ;;  %v23_v2 = vadd.f32 %v21_v0, %v21_v0  ;;  %v24_v3 = vadd.f32 %v22_v1, %v22_v1  ;;  %s36_s19 = int_to_ptr.vmem [resolvable:$true] %s35_s19 }
  0x14   :  { %s68_s20 = scalar_lea.vmem %s36_s19, 256  ;;  %p73_p9 = scmp.lt.s32.totalorder %s36_s19, %s36_s19 }
  0x15   :  { %v25_v4 = vmax.f32 %v23_v2, 0.0  ;;  %v26_v5 = vmax.f32 %v24_v3, 0.0  ;;  %p69_p8 = scmp.ne.s32.totalorder %s36_s19, %s68_s20  ;;  %p74_p10 = scmp.lt.s32.totalorder %s68_s20, %s68_s20 }
  0x17   :  { %27 = vst [vmem:[#allocation5] sm:$0xff] %v25_v4  ;;  %28 = vst [vmem:[#allocation5 + $0x8] sm:$0xff] %v26_v5  ;;  %p75_p11 = por %p74_p10, %p73_p9 }
  0x19   :  { %p76_p12 = pnand %p75_p11, %p69_p8 }
  0x1b   :  { %79 = shalt.err (!%p76_p12)
}
  0x1c   :  { %s80_s22 = scalar_lea.hbm %s131_s1, 256 }
  0x1d   :  { %p81_p13 = scmp.ne.s32.totalorder %s131_s1, %s80_s22  ;;  %p84_p0 = scmp.lt.u32.totalorder %s80_s22, %s131_s1 }
  0x1f   :  { %p86_p1 = pnand %p84_p0, %p81_p13 }
  0x21   :  { %89 = shalt.err (!%p86_p1)
}
  0x22   :  { %38 = dma.vmem_to_hbm [thread:$0]  %s36_s19, 256, %s131_s1, [#allocation4]  }
  0x23   :  { %92 = dma.done.wait [#allocation4], 256  }
  0x24   :  { %93 = vsyncadd [#allocation4], 4294967040 }
  0x25   :  { %42 = vsyncpa [#allocation3], 1 }
  0x26   :  { %43 = vsyncpa [#allocation4], 1 }

</bundles_post_ra>
